<compile_context>
chip_gen: v7x
topology: tpu7x:2x2x1
jax: 0.10.0
libtpu: 0.0.40
codegen_flags: <defaults>
</compile_context>

<pallas_src>
import math
import numpy as np

import jax
import jax.numpy as jnp
from jax.experimental import pallas as pl
from jax.experimental.pallas import tpu as pltpu

WINDOW_SIZE = 3
SIGMA = 1.5
STRIDE = 3
C1 = 0.01 ** 2
C2 = 0.03 ** 2

_LANES = 128
_SUBLANES = 8
_TM_TARGET = 1024          # rows of 128 lanes per block (~4.5 MiB per input block)


def gaussian_1d(window_size, sigma):
    g = np.array(
        [math.exp(-((x - window_size // 2) ** 2) / float(2 * sigma ** 2))
         for x in range(window_size)],
        dtype=np.float64,
    )
    return (g / g.sum()).astype(np.float32)


def _choose_tiling(n_elems, tm_target=_TM_TARGET):
    """Rows-per-block, number of blocks, padded row count for the flat domain."""
    m = -(-n_elems // _LANES)                                  # 128-lane rows needed
    m = ((m + _SUBLANES - 1) // _SUBLANES) * _SUBLANES         # sublane-align
    if m <= _SUBLANES:
        return m, 1, m
    # v7x has two TensorCores: prefer an even number of equally sized blocks.
    n_blocks = max(2, -(-m // tm_target))
    if n_blocks % 2:
        n_blocks += 1
    tm = ((-(-m // n_blocks) + _SUBLANES - 1) // _SUBLANES) * _SUBLANES
    n_blocks = -(-m // tm)
    if n_blocks % 2 and n_blocks > 1:
        n_blocks += 1
    return tm, n_blocks, tm * n_blocks


def _make_ssim_kernel(w2_flat, taps, tm, n_valid, n_padded):
    """Per-block SSIM partial-sum kernel: aligned vreg tap loads, vreg accumulators."""
    n_chunks = tm // _SUBLANES
    needs_mask = n_valid < n_padded

    def kernel(x1_ref, x2_ref, out_ref):
        if needs_mask:
            # Hoisted once per grid step: local flat-index pattern of one chunk.
            sub = jax.lax.broadcasted_iota(jnp.int32, (_SUBLANES, _LANES), 0)
            lane = jax.lax.broadcasted_iota(jnp.int32, (_SUBLANES, _LANES), 1)
            local_idx = sub * _LANES + lane
            block_base = pl.program_id(0) * (tm * _LANES)
        else:
            local_idx = None
            block_base = None

        def chunk(ci, total):
            r0 = ci * _SUBLANES
            rs = pl.ds(pl.multiple_of(r0, _SUBLANES), _SUBLANES)

            # Tap 0 (peeled) -- each tap load is an aligned (8,128) vreg load.
            w0 = w2_flat[0]
            a = x1_ref[0, rs, :]
            b = x2_ref[0, rs, :]
            mu1 = w0 * a
            mu2 = w0 * b
            e11 = w0 * (a * a)
            e22 = w0 * (b * b)
            e12 = w0 * (a * b)
            for t in range(1, taps):
                w = w2_flat[t]
                a = x1_ref[t, rs, :]
                b = x2_ref[t, rs, :]
                mu1 = mu1 + w * a
                mu2 = mu2 + w * b
                e11 = e11 + w * (a * a)
                e22 = e22 + w * (b * b)
                e12 = e12 + w * (a * b)

            mu1sq = mu1 * mu1
            mu2sq = mu2 * mu2
            mu12 = mu1 * mu2
            s11 = e11 - mu1sq
            s22 = e22 - mu2sq
            s12 = e12 - mu12
            num = (2.0 * mu12 + C1) * (2.0 * s12 + C2)
            den = (mu1sq + mu2sq + C1) * (s11 + s22 + C2)
            # EUP approx reciprocal + one Newton step: divide off the VALU,
            # f32-accurate for the 1e-4 tolerance.
            r = pl.reciprocal(den, approx=True)
            r = r * (2.0 - den * r)
            val = num * r
            if needs_mask:
                flat = block_base + r0 * _LANES + local_idx
                val = jnp.where(flat < n_valid, val, 0.0)
            return total + val

        total = jax.lax.fori_loop(
            0, n_chunks, chunk,
            jnp.zeros((_SUBLANES, _LANES), jnp.float32))
        # Lane-dense, unmasked full-tile store of the per-block partial sums.
        out_ref[0] = total

    return kernel


def ssim_pallas(img1, img2, window_size=WINDOW_SIZE, stride=STRIDE, sigma=SIGMA):
    assert window_size == stride, "tap layout assumes stride == window_size"
    b, c, h, w = img1.shape
    ws = window_size
    pad = (ws - 1) // 2
    ho = (h + 2 * pad - ws) // stride + 1
    wo = (w + 2 * pad - ws) // stride + 1
    hp = stride * (ho - 1) + ws      # padded extent actually touched by the conv
    wp = stride * (wo - 1) + ws
    bc = b * c
    taps = ws * ws
    n_out = bc * ho * wo             # number of valid SSIM-map elements

    tm, n_blocks, m_pad = _choose_tiling(n_out)
    n_padded = m_pad * _LANES

    g = gaussian_1d(ws, sigma)
    w2_flat = tuple(float(v) for v in np.outer(g, g).reshape(-1))  # 2D Gaussian window

    def prep(x):
        x = x.reshape(bc, h, w).astype(jnp.float32)
        x = jnp.pad(x, ((0, 0), (pad, pad), (pad, pad)))[:, :hp, :wp]
        # (BC,Hp,Wp) -> (BC,Ho,ws,Wo,ws) -> tap-leading (ws,ws,BC,Ho,Wo)
        x = x.reshape(bc, ho, ws, wo, ws)
        x = jnp.transpose(x, (2, 4, 0, 1, 3))
        x = x.reshape(taps, n_out)
        x = jnp.pad(x, ((0, 0), (0, n_padded - n_out)))
        return x.reshape(taps, m_pad, _LANES)

    x1 = prep(img1)
    x2 = prep(img2)

    block_bytes = taps * tm * _LANES * 4
    # 2 inputs x 2 pipeline buffers + output/epilogue headroom; <= 48 MiB (v7x-safe).
    vmem_limit = int(min(48 * 2 ** 20, max(32 * 2 ** 20, 4 * block_bytes + 8 * 2 ** 20)))

    in_spec = pl.BlockSpec((taps, tm, _LANES), lambda i: (0, i, 0))
    out_spec = pl.BlockSpec((1, _SUBLANES, _LANES), lambda i: (i, 0, 0))

    cost = pl.CostEstimate(
        flops=int(n_out * (13 * taps + 30)),
        transcendentals=int(n_out),
        bytes_accessed=int(2 * taps * n_padded * 4
                           + n_blocks * _SUBLANES * _LANES * 4),
    )

    partials = pl.pallas_call(
        _make_ssim_kernel(w2_flat, taps, tm, n_out, n_padded),
        out_shape=jax.ShapeDtypeStruct((n_blocks, _SUBLANES, _LANES), jnp.float32),
        grid=(n_blocks,),
        in_specs=[in_spec, in_spec],
        out_specs=out_spec,
        compiler_params=pltpu.CompilerParams(
            dimension_semantics=("parallel",),
            vmem_limit_bytes=vmem_limit,
        ),
        cost_estimate=cost,
    )(x1, x2)

    # size_average=True -> global mean over (B, C, Ho, Wo)
    return jnp.sum(partials) / float(n_out)


def ssim_reference(img1, img2, window_size=WINDOW_SIZE, stride=STRIDE):
    """Plain-JAX reference mirroring the PyTorch module (validation only)."""
    b, c, h, w = img1.shape
    g = gaussian_1d(window_size, SIGMA)
    w2 = np.outer(g, g).astype(np.float32)
    kern = jnp.asarray(np.tile(w2[None, None], (c, 1, 1, 1)))  # (C,1,k,k)
    pad = (window_size - 1) // 2

    def conv(x):
        return jax.lax.conv_general_dilated(
            x.astype(jnp.float32), kern,
            window_strides=(stride, stride),
            padding=[(pad, pad), (pad, pad)],
            feature_group_count=c,
            dimension_numbers=('NCHW', 'OIHW', 'NCHW'))

    mu1, mu2 = conv(img1), conv(img2)
    s11 = conv(img1 * img1) - mu1 * mu1
    s22 = conv(img2 * img2) - mu2 * mu2
    s12 = conv(img1 * img2) - mu1 * mu2
    m = ((2 * mu1 * mu2 + C1) * (2 * s12 + C2)) / \
        ((mu1 * mu1 + mu2 * mu2 + C1) * (s11 + s22 + C2))
    return jnp.mean(m)


if __name__ == "__main__":
    key = jax.random.PRNGKey(0)
    k1, k2 = jax.random.split(key)
    img1 = jax.random.uniform(k1, (2, 4, 16, 16), dtype=jnp.float32)
    img2 = jax.random.uniform(k2, (2, 4, 16, 16), dtype=jnp.float32)

    out = jax.jit(ssim_pallas)(img1, img2)
    out = jax.block_until_ready(out)

    ref = jax.block_until_ready(ssim_reference(img1, img2))
    assert abs(float(out) - float(ref)) < 1e-4, (float(out), float(ref))

    print("KERNEL_OK")
</pallas_src>

<mosaic_0001>
module attributes {stable_mosaic.version = 11 : i64} {
  func.func @kernel(%arg0: i32, %arg1: memref<9x8x128xf32, #tpu.memory_space<vmem>>, %arg2: memref<9x8x128xf32, #tpu.memory_space<vmem>>, %arg3: memref<1x8x128xf32, #tpu.memory_space<vmem>>) attributes {dimension_semantics = [#tpu.dimension_semantics<parallel>], iteration_bounds = array<i64: 1>, scalar_prefetch = 0 : i64, scratch_operands = 0 : i64, tpu.core_type = #tpu.core_type<tc>, window_params = [{transform_indices = @transform_0, window_bounds = array<i64: 9, 8, 128>}, {transform_indices = @transform_1, window_bounds = array<i64: 9, 8, 128>}, {transform_indices = @transform_2, window_bounds = array<i64: 1, 8, 128>}]} {
    %0 = tpu.iota {dimensions = array<i32: 0>} : vector<8x128xi32>
    %1 = tpu.iota {dimensions = array<i32: 1>} : vector<8x128xi32>
    %c128_i32 = arith.constant 128 : i32
    %2 = vector.broadcast %c128_i32 : i32 to vector<8x128xi32>
    %3 = arith.muli %0, %2 : vector<8x128xi32>
    %4 = arith.addi %3, %1 : vector<8x128xi32>
    %c1024_i32 = arith.constant 1024 : i32
    %5 = arith.muli %arg0, %c1024_i32 : i32
    %cst = arith.constant 0.000000e+00 : f32
    %6 = vector.broadcast %cst : f32 to vector<8x128xf32>
    %c0_i32 = arith.constant 0 : i32
    %c8_i32 = arith.constant 8 : i32
    %7 = arith.muli %c0_i32, %c8_i32 : i32
    %8 = tpu.assume_multiple %7, 8 : i32
    %c0 = arith.constant 0 : index
    %9 = arith.index_cast %8 : i32 to index
    %c0_0 = arith.constant 0 : index
    %10 = vector.load %arg1[%c0, %9, %c0_0] : memref<9x8x128xf32, #tpu.memory_space<vmem>>, vector<1x8x128xf32>
    %11 = vector.shape_cast %10 : vector<1x8x128xf32> to vector<8x128xf32>
    %c0_1 = arith.constant 0 : index
    %12 = arith.index_cast %8 : i32 to index
    %c0_2 = arith.constant 0 : index
    %13 = vector.load %arg2[%c0_1, %12, %c0_2] : memref<9x8x128xf32, #tpu.memory_space<vmem>>, vector<1x8x128xf32>
    %14 = vector.shape_cast %13 : vector<1x8x128xf32> to vector<8x128xf32>
    %cst_3 = arith.constant 0.0947416648 : f32
    %15 = vector.broadcast %cst_3 : f32 to vector<8x128xf32>
    %16 = arith.mulf %15, %11 : vector<8x128xf32>
    %cst_4 = arith.constant 0.0947416648 : f32
    %17 = vector.broadcast %cst_4 : f32 to vector<8x128xf32>
    %18 = arith.mulf %17, %14 : vector<8x128xf32>
    %19 = arith.mulf %11, %11 : vector<8x128xf32>
    %cst_5 = arith.constant 0.0947416648 : f32
    %20 = vector.broadcast %cst_5 : f32 to vector<8x128xf32>
    %21 = arith.mulf %20, %19 : vector<8x128xf32>
    %22 = arith.mulf %14, %14 : vector<8x128xf32>
    %cst_6 = arith.constant 0.0947416648 : f32
    %23 = vector.broadcast %cst_6 : f32 to vector<8x128xf32>
    %24 = arith.mulf %23, %22 : vector<8x128xf32>
    %25 = arith.mulf %11, %14 : vector<8x128xf32>
    %cst_7 = arith.constant 0.0947416648 : f32
    %26 = vector.broadcast %cst_7 : f32 to vector<8x128xf32>
    %27 = arith.mulf %26, %25 : vector<8x128xf32>
    %c1 = arith.constant 1 : index
    %28 = arith.index_cast %8 : i32 to index
    %c0_8 = arith.constant 0 : index
    %29 = vector.load %arg1[%c1, %28, %c0_8] : memref<9x8x128xf32, #tpu.memory_space<vmem>>, vector<1x8x128xf32>
    %30 = vector.shape_cast %29 : vector<1x8x128xf32> to vector<8x128xf32>
    %c1_9 = arith.constant 1 : index
    %31 = arith.index_cast %8 : i32 to index
    %c0_10 = arith.constant 0 : index
    %32 = vector.load %arg2[%c1_9, %31, %c0_10] : memref<9x8x128xf32, #tpu.memory_space<vmem>>, vector<1x8x128xf32>
    %33 = vector.shape_cast %32 : vector<1x8x128xf32> to vector<8x128xf32>
    %cst_11 = arith.constant 0.118318014 : f32
    %34 = vector.broadcast %cst_11 : f32 to vector<8x128xf32>
    %35 = arith.mulf %34, %30 : vector<8x128xf32>
    %36 = arith.addf %16, %35 : vector<8x128xf32>
    %cst_12 = arith.constant 0.118318014 : f32
    %37 = vector.broadcast %cst_12 : f32 to vector<8x128xf32>
    %38 = arith.mulf %37, %33 : vector<8x128xf32>
    %39 = arith.addf %18, %38 : vector<8x128xf32>
    %40 = arith.mulf %30, %30 : vector<8x128xf32>
    %cst_13 = arith.constant 0.118318014 : f32
    %41 = vector.broadcast %cst_13 : f32 to vector<8x128xf32>
    %42 = arith.mulf %41, %40 : vector<8x128xf32>
    %43 = arith.addf %21, %42 : vector<8x128xf32>
    %44 = arith.mulf %33, %33 : vector<8x128xf32>
    %cst_14 = arith.constant 0.118318014 : f32
    %45 = vector.broadcast %cst_14 : f32 to vector<8x128xf32>
    %46 = arith.mulf %45, %44 : vector<8x128xf32>
    %47 = arith.addf %24, %46 : vector<8x128xf32>
    %48 = arith.mulf %30, %33 : vector<8x128xf32>
    %cst_15 = arith.constant 0.118318014 : f32
    %49 = vector.broadcast %cst_15 : f32 to vector<8x128xf32>
    %50 = arith.mulf %49, %48 : vector<8x128xf32>
    %51 = arith.addf %27, %50 : vector<8x128xf32>
    %c2 = arith.constant 2 : index
    %52 = arith.index_cast %8 : i32 to index
    %c0_16 = arith.constant 0 : index
    %53 = vector.load %arg1[%c2, %52, %c0_16] : memref<9x8x128xf32, #tpu.memory_space<vmem>>, vector<1x8x128xf32>
    %54 = vector.shape_cast %53 : vector<1x8x128xf32> to vector<8x128xf32>
    %c2_17 = arith.constant 2 : index
    %55 = arith.index_cast %8 : i32 to index
    %c0_18 = arith.constant 0 : index
    %56 = vector.load %arg2[%c2_17, %55, %c0_18] : memref<9x8x128xf32, #tpu.memory_space<vmem>>, vector<1x8x128xf32>
    %57 = vector.shape_cast %56 : vector<1x8x128xf32> to vector<8x128xf32>
    %cst_19 = arith.constant 0.0947416648 : f32
    %58 = vector.broadcast %cst_19 : f32 to vector<8x128xf32>
    %59 = arith.mulf %58, %54 : vector<8x128xf32>
    %60 = arith.addf %36, %59 : vector<8x128xf32>
    %cst_20 = arith.constant 0.0947416648 : f32
    %61 = vector.broadcast %cst_20 : f32 to vector<8x128xf32>
    %62 = arith.mulf %61, %57 : vector<8x128xf32>
    %63 = arith.addf %39, %62 : vector<8x128xf32>
    %64 = arith.mulf %54, %54 : vector<8x128xf32>
    %cst_21 = arith.constant 0.0947416648 : f32
    %65 = vector.broadcast %cst_21 : f32 to vector<8x128xf32>
    %66 = arith.mulf %65, %64 : vector<8x128xf32>
    %67 = arith.addf %43, %66 : vector<8x128xf32>
    %68 = arith.mulf %57, %57 : vector<8x128xf32>
    %cst_22 = arith.constant 0.0947416648 : f32
    %69 = vector.broadcast %cst_22 : f32 to vector<8x128xf32>
    %70 = arith.mulf %69, %68 : vector<8x128xf32>
    %71 = arith.addf %47, %70 : vector<8x128xf32>
    %72 = arith.mulf %54, %57 : vector<8x128xf32>
    %cst_23 = arith.constant 0.0947416648 : f32
    %73 = vector.broadcast %cst_23 : f32 to vector<8x128xf32>
    %74 = arith.mulf %73, %72 : vector<8x128xf32>
    %75 = arith.addf %51, %74 : vector<8x128xf32>
    %c3 = arith.constant 3 : index
    %76 = arith.index_cast %8 : i32 to index
    %c0_24 = arith.constant 0 : index
    %77 = vector.load %arg1[%c3, %76, %c0_24] : memref<9x8x128xf32, #tpu.memory_space<vmem>>, vector<1x8x128xf32>
    %78 = vector.shape_cast %77 : vector<1x8x128xf32> to vector<8x128xf32>
    %c3_25 = arith.constant 3 : index
    %79 = arith.index_cast %8 : i32 to index
    %c0_26 = arith.constant 0 : index
    %80 = vector.load %arg2[%c3_25, %79, %c0_26] : memref<9x8x128xf32, #tpu.memory_space<vmem>>, vector<1x8x128xf32>
    %81 = vector.shape_cast %80 : vector<1x8x128xf32> to vector<8x128xf32>
    %cst_27 = arith.constant 0.118318014 : f32
    %82 = vector.broadcast %cst_27 : f32 to vector<8x128xf32>
    %83 = arith.mulf %82, %78 : vector<8x128xf32>
    %84 = arith.addf %60, %83 : vector<8x128xf32>
    %cst_28 = arith.constant 0.118318014 : f32
    %85 = vector.broadcast %cst_28 : f32 to vector<8x128xf32>
    %86 = arith.mulf %85, %81 : vector<8x128xf32>
    %87 = arith.addf %63, %86 : vector<8x128xf32>
    %88 = arith.mulf %78, %78 : vector<8x128xf32>
    %cst_29 = arith.constant 0.118318014 : f32
    %89 = vector.broadcast %cst_29 : f32 to vector<8x128xf32>
    %90 = arith.mulf %89, %88 : vector<8x128xf32>
    %91 = arith.addf %67, %90 : vector<8x128xf32>
    %92 = arith.mulf %81, %81 : vector<8x128xf32>
    %cst_30 = arith.constant 0.118318014 : f32
    %93 = vector.broadcast %cst_30 : f32 to vector<8x128xf32>
    %94 = arith.mulf %93, %92 : vector<8x128xf32>
    %95 = arith.addf %71, %94 : vector<8x128xf32>
    %96 = arith.mulf %78, %81 : vector<8x128xf32>
    %cst_31 = arith.constant 0.118318014 : f32
    %97 = vector.broadcast %cst_31 : f32 to vector<8x128xf32>
    %98 = arith.mulf %97, %96 : vector<8x128xf32>
    %99 = arith.addf %75, %98 : vector<8x128xf32>
    %c4 = arith.constant 4 : index
    %100 = arith.index_cast %8 : i32 to index
    %c0_32 = arith.constant 0 : index
    %101 = vector.load %arg1[%c4, %100, %c0_32] : memref<9x8x128xf32, #tpu.memory_space<vmem>>, vector<1x8x128xf32>
    %102 = vector.shape_cast %101 : vector<1x8x128xf32> to vector<8x128xf32>
    %c4_33 = arith.constant 4 : index
    %103 = arith.index_cast %8 : i32 to index
    %c0_34 = arith.constant 0 : index
    %104 = vector.load %arg2[%c4_33, %103, %c0_34] : memref<9x8x128xf32, #tpu.memory_space<vmem>>, vector<1x8x128xf32>
    %105 = vector.shape_cast %104 : vector<1x8x128xf32> to vector<8x128xf32>
    %cst_35 = arith.constant 0.1477613 : f32
    %106 = vector.broadcast %cst_35 : f32 to vector<8x128xf32>
    %107 = arith.mulf %106, %102 : vector<8x128xf32>
    %108 = arith.addf %84, %107 : vector<8x128xf32>
    %cst_36 = arith.constant 0.1477613 : f32
    %109 = vector.broadcast %cst_36 : f32 to vector<8x128xf32>
    %110 = arith.mulf %109, %105 : vector<8x128xf32>
    %111 = arith.addf %87, %110 : vector<8x128xf32>
    %112 = arith.mulf %102, %102 : vector<8x128xf32>
    %cst_37 = arith.constant 0.1477613 : f32
    %113 = vector.broadcast %cst_37 : f32 to vector<8x128xf32>
    %114 = arith.mulf %113, %112 : vector<8x128xf32>
    %115 = arith.addf %91, %114 : vector<8x128xf32>
    %116 = arith.mulf %105, %105 : vector<8x128xf32>
    %cst_38 = arith.constant 0.1477613 : f32
    %117 = vector.broadcast %cst_38 : f32 to vector<8x128xf32>
    %118 = arith.mulf %117, %116 : vector<8x128xf32>
    %119 = arith.addf %95, %118 : vector<8x128xf32>
    %120 = arith.mulf %102, %105 : vector<8x128xf32>
    %cst_39 = arith.constant 0.1477613 : f32
    %121 = vector.broadcast %cst_39 : f32 to vector<8x128xf32>
    %122 = arith.mulf %121, %120 : vector<8x128xf32>
    %123 = arith.addf %99, %122 : vector<8x128xf32>
    %c5 = arith.constant 5 : index
    %124 = arith.index_cast %8 : i32 to index
    %c0_40 = arith.constant 0 : index
    %125 = vector.load %arg1[%c5, %124, %c0_40] : memref<9x8x128xf32, #tpu.memory_space<vmem>>, vector<1x8x128xf32>
    %126 = vector.shape_cast %125 : vector<1x8x128xf32> to vector<8x128xf32>
    %c5_41 = arith.constant 5 : index
    %127 = arith.index_cast %8 : i32 to index
    %c0_42 = arith.constant 0 : index
    %128 = vector.load %arg2[%c5_41, %127, %c0_42] : memref<9x8x128xf32, #tpu.memory_space<vmem>>, vector<1x8x128xf32>
    %129 = vector.shape_cast %128 : vector<1x8x128xf32> to vector<8x128xf32>
    %cst_43 = arith.constant 0.118318014 : f32
    %130 = vector.broadcast %cst_43 : f32 to vector<8x128xf32>
    %131 = arith.mulf %130, %126 : vector<8x128xf32>
    %132 = arith.addf %108, %131 : vector<8x128xf32>
    %cst_44 = arith.constant 0.118318014 : f32
    %133 = vector.broadcast %cst_44 : f32 to vector<8x128xf32>
    %134 = arith.mulf %133, %129 : vector<8x128xf32>
    %135 = arith.addf %111, %134 : vector<8x128xf32>
    %136 = arith.mulf %126, %126 : vector<8x128xf32>
    %cst_45 = arith.constant 0.118318014 : f32
    %137 = vector.broadcast %cst_45 : f32 to vector<8x128xf32>
    %138 = arith.mulf %137, %136 : vector<8x128xf32>
    %139 = arith.addf %115, %138 : vector<8x128xf32>
    %140 = arith.mulf %129, %129 : vector<8x128xf32>
    %cst_46 = arith.constant 0.118318014 : f32
    %141 = vector.broadcast %cst_46 : f32 to vector<8x128xf32>
    %142 = arith.mulf %141, %140 : vector<8x128xf32>
    %143 = arith.addf %119, %142 : vector<8x128xf32>
    %144 = arith.mulf %126, %129 : vector<8x128xf32>
    %cst_47 = arith.constant 0.118318014 : f32
    %145 = vector.broadcast %cst_47 : f32 to vector<8x128xf32>
    %146 = arith.mulf %145, %144 : vector<8x128xf32>
    %147 = arith.addf %123, %146 : vector<8x128xf32>
    %c6 = arith.constant 6 : index
    %148 = arith.index_cast %8 : i32 to index
    %c0_48 = arith.constant 0 : index
    %149 = vector.load %arg1[%c6, %148, %c0_48] : memref<9x8x128xf32, #tpu.memory_space<vmem>>, vector<1x8x128xf32>
    %150 = vector.shape_cast %149 : vector<1x8x128xf32> to vector<8x128xf32>
    %c6_49 = arith.constant 6 : index
    %151 = arith.index_cast %8 : i32 to index
    %c0_50 = arith.constant 0 : index
    %152 = vector.load %arg2[%c6_49, %151, %c0_50] : memref<9x8x128xf32, #tpu.memory_space<vmem>>, vector<1x8x128xf32>
    %153 = vector.shape_cast %152 : vector<1x8x128xf32> to vector<8x128xf32>
    %cst_51 = arith.constant 0.0947416648 : f32
    %154 = vector.broadcast %cst_51 : f32 to vector<8x128xf32>
    %155 = arith.mulf %154, %150 : vector<8x128xf32>
    %156 = arith.addf %132, %155 : vector<8x128xf32>
    %cst_52 = arith.constant 0.0947416648 : f32
    %157 = vector.broadcast %cst_52 : f32 to vector<8x128xf32>
    %158 = arith.mulf %157, %153 : vector<8x128xf32>
    %159 = arith.addf %135, %158 : vector<8x128xf32>
    %160 = arith.mulf %150, %150 : vector<8x128xf32>
    %cst_53 = arith.constant 0.0947416648 : f32
    %161 = vector.broadcast %cst_53 : f32 to vector<8x128xf32>
    %162 = arith.mulf %161, %160 : vector<8x128xf32>
    %163 = arith.addf %139, %162 : vector<8x128xf32>
    %164 = arith.mulf %153, %153 : vector<8x128xf32>
    %cst_54 = arith.constant 0.0947416648 : f32
    %165 = vector.broadcast %cst_54 : f32 to vector<8x128xf32>
    %166 = arith.mulf %165, %164 : vector<8x128xf32>
    %167 = arith.addf %143, %166 : vector<8x128xf32>
    %168 = arith.mulf %150, %153 : vector<8x128xf32>
    %cst_55 = arith.constant 0.0947416648 : f32
    %169 = vector.broadcast %cst_55 : f32 to vector<8x128xf32>
    %170 = arith.mulf %169, %168 : vector<8x128xf32>
    %171 = arith.addf %147, %170 : vector<8x128xf32>
    %c7 = arith.constant 7 : index
    %172 = arith.index_cast %8 : i32 to index
    %c0_56 = arith.constant 0 : index
    %173 = vector.load %arg1[%c7, %172, %c0_56] : memref<9x8x128xf32, #tpu.memory_space<vmem>>, vector<1x8x128xf32>
    %174 = vector.shape_cast %173 : vector<1x8x128xf32> to vector<8x128xf32>
    %c7_57 = arith.constant 7 : index
    %175 = arith.index_cast %8 : i32 to index
    %c0_58 = arith.constant 0 : index
    %176 = vector.load %arg2[%c7_57, %175, %c0_58] : memref<9x8x128xf32, #tpu.memory_space<vmem>>, vector<1x8x128xf32>
    %177 = vector.shape_cast %176 : vector<1x8x128xf32> to vector<8x128xf32>
    %cst_59 = arith.constant 0.118318014 : f32
    %178 = vector.broadcast %cst_59 : f32 to vector<8x128xf32>
    %179 = arith.mulf %178, %174 : vector<8x128xf32>
    %180 = arith.addf %156, %179 : vector<8x128xf32>
    %cst_60 = arith.constant 0.118318014 : f32
    %181 = vector.broadcast %cst_60 : f32 to vector<8x128xf32>
    %182 = arith.mulf %181, %177 : vector<8x128xf32>
    %183 = arith.addf %159, %182 : vector<8x128xf32>
    %184 = arith.mulf %174, %174 : vector<8x128xf32>
    %cst_61 = arith.constant 0.118318014 : f32
    %185 = vector.broadcast %cst_61 : f32 to vector<8x128xf32>
    %186 = arith.mulf %185, %184 : vector<8x128xf32>
    %187 = arith.addf %163, %186 : vector<8x128xf32>
    %188 = arith.mulf %177, %177 : vector<8x128xf32>
    %cst_62 = arith.constant 0.118318014 : f32
    %189 = vector.broadcast %cst_62 : f32 to vector<8x128xf32>
    %190 = arith.mulf %189, %188 : vector<8x128xf32>
    %191 = arith.addf %167, %190 : vector<8x128xf32>
    %192 = arith.mulf %174, %177 : vector<8x128xf32>
    %cst_63 = arith.constant 0.118318014 : f32
    %193 = vector.broadcast %cst_63 : f32 to vector<8x128xf32>
    %194 = arith.mulf %193, %192 : vector<8x128xf32>
    %195 = arith.addf %171, %194 : vector<8x128xf32>
    %c8 = arith.constant 8 : index
    %196 = arith.index_cast %8 : i32 to index
    %c0_64 = arith.constant 0 : index
    %197 = vector.load %arg1[%c8, %196, %c0_64] : memref<9x8x128xf32, #tpu.memory_space<vmem>>, vector<1x8x128xf32>
    %198 = vector.shape_cast %197 : vector<1x8x128xf32> to vector<8x128xf32>
    %c8_65 = arith.constant 8 : index
    %199 = arith.index_cast %8 : i32 to index
    %c0_66 = arith.constant 0 : index
    %200 = vector.load %arg2[%c8_65, %199, %c0_66] : memref<9x8x128xf32, #tpu.memory_space<vmem>>, vector<1x8x128xf32>
    %201 = vector.shape_cast %200 : vector<1x8x128xf32> to vector<8x128xf32>
    %cst_67 = arith.constant 0.0947416648 : f32
    %202 = vector.broadcast %cst_67 : f32 to vector<8x128xf32>
    %203 = arith.mulf %202, %198 : vector<8x128xf32>
    %204 = arith.addf %180, %203 : vector<8x128xf32>
    %cst_68 = arith.constant 0.0947416648 : f32
    %205 = vector.broadcast %cst_68 : f32 to vector<8x128xf32>
    %206 = arith.mulf %205, %201 : vector<8x128xf32>
    %207 = arith.addf %183, %206 : vector<8x128xf32>
    %208 = arith.mulf %198, %198 : vector<8x128xf32>
    %cst_69 = arith.constant 0.0947416648 : f32
    %209 = vector.broadcast %cst_69 : f32 to vector<8x128xf32>
    %210 = arith.mulf %209, %208 : vector<8x128xf32>
    %211 = arith.addf %187, %210 : vector<8x128xf32>
    %212 = arith.mulf %201, %201 : vector<8x128xf32>
    %cst_70 = arith.constant 0.0947416648 : f32
    %213 = vector.broadcast %cst_70 : f32 to vector<8x128xf32>
    %214 = arith.mulf %213, %212 : vector<8x128xf32>
    %215 = arith.addf %191, %214 : vector<8x128xf32>
    %216 = arith.mulf %198, %201 : vector<8x128xf32>
    %cst_71 = arith.constant 0.0947416648 : f32
    %217 = vector.broadcast %cst_71 : f32 to vector<8x128xf32>
    %218 = arith.mulf %217, %216 : vector<8x128xf32>
    %219 = arith.addf %195, %218 : vector<8x128xf32>
    %220 = arith.mulf %204, %204 : vector<8x128xf32>
    %221 = arith.mulf %207, %207 : vector<8x128xf32>
    %222 = arith.mulf %204, %207 : vector<8x128xf32>
    %223 = arith.subf %211, %220 : vector<8x128xf32>
    %224 = arith.subf %215, %221 : vector<8x128xf32>
    %225 = arith.subf %219, %222 : vector<8x128xf32>
    %cst_72 = arith.constant 2.000000e+00 : f32
    %226 = vector.broadcast %cst_72 : f32 to vector<8x128xf32>
    %227 = arith.mulf %226, %222 : vector<8x128xf32>
    %cst_73 = arith.constant 9.99999974E-5 : f32
    %228 = vector.broadcast %cst_73 : f32 to vector<8x128xf32>
    %229 = arith.addf %227, %228 : vector<8x128xf32>
    %cst_74 = arith.constant 2.000000e+00 : f32
    %230 = vector.broadcast %cst_74 : f32 to vector<8x128xf32>
    %231 = arith.mulf %230, %225 : vector<8x128xf32>
    %cst_75 = arith.constant 8.99999984E-4 : f32
    %232 = vector.broadcast %cst_75 : f32 to vector<8x128xf32>
    %233 = arith.addf %231, %232 : vector<8x128xf32>
    %234 = arith.mulf %229, %233 : vector<8x128xf32>
    %235 = arith.addf %220, %221 : vector<8x128xf32>
    %cst_76 = arith.constant 9.99999974E-5 : f32
    %236 = vector.broadcast %cst_76 : f32 to vector<8x128xf32>
    %237 = arith.addf %235, %236 : vector<8x128xf32>
    %238 = arith.addf %223, %224 : vector<8x128xf32>
    %cst_77 = arith.constant 8.99999984E-4 : f32
    %239 = vector.broadcast %cst_77 : f32 to vector<8x128xf32>
    %240 = arith.addf %238, %239 : vector<8x128xf32>
    %241 = arith.mulf %237, %240 : vector<8x128xf32>
    %242 = tpu.reciprocal %241 {approx = true} : vector<8x128xf32> -> vector<8x128xf32>
    %243 = arith.mulf %241, %242 : vector<8x128xf32>
    %cst_78 = arith.constant 2.000000e+00 : f32
    %244 = vector.broadcast %cst_78 : f32 to vector<8x128xf32>
    %245 = arith.subf %244, %243 : vector<8x128xf32>
    %246 = arith.mulf %242, %245 : vector<8x128xf32>
    %247 = arith.mulf %234, %246 : vector<8x128xf32>
    %c128_i32_79 = arith.constant 128 : i32
    %248 = arith.muli %7, %c128_i32_79 : i32
    %249 = arith.addi %5, %248 : i32
    %250 = vector.broadcast %249 : i32 to vector<8x128xi32>
    %251 = arith.addi %250, %4 : vector<8x128xi32>
    %c288_i32 = arith.constant 288 : i32
    %252 = vector.broadcast %c288_i32 : i32 to vector<8x128xi32>
    %253 = arith.cmpi slt, %251, %252 : vector<8x128xi32>
    %cst_80 = arith.constant 0.000000e+00 : f32
    %254 = vector.broadcast %cst_80 : f32 to vector<8x128xf32>
    %255 = arith.select %253, %247, %254 : vector<8x128xi1>, vector<8x128xf32>
    %256 = arith.addf %6, %255 : vector<8x128xf32>
    %c1_i32 = arith.constant 1 : i32
    %c0_81 = arith.constant 0 : index
    %c0_82 = arith.constant 0 : index
    %c0_83 = arith.constant 0 : index
    %257 = vector.load %arg3[%c0_81, %c0_82, %c0_83] : memref<1x8x128xf32, #tpu.memory_space<vmem>>, vector<1x8x128xf32>
    %258 = vector.shape_cast %257 : vector<1x8x128xf32> to vector<8x128xf32>
    %259 = vector.shape_cast %256 : vector<8x128xf32> to vector<1x8x128xf32>
    tpu.vector_store %arg3[%c0_81, %c0_82, %c0_83], %259 {strides = array<i32>} : memref<1x8x128xf32, #tpu.memory_space<vmem>>, vector<1x8x128xf32>,
    return
  }
  func.func @transform_0(%arg0: i32) -> (i32, i32, i32) {
    %c0_i32 = arith.constant 0 : i32
    %c0_i32_0 = arith.constant 0 : i32
    %c0_i32_1 = arith.constant 0 : i32
    return %c0_i32, %arg0, %c0_i32_0 : i32, i32, i32
  }
  func.func @transform_1(%arg0: i32) -> (i32, i32, i32) {
    %c0_i32 = arith.constant 0 : i32
    %c0_i32_0 = arith.constant 0 : i32
    %c0_i32_1 = arith.constant 0 : i32
    return %c0_i32, %arg0, %c0_i32_0 : i32, i32, i32
  }
  func.func @transform_2(%arg0: i32) -> (i32, i32, i32) {
    %c0_i32 = arith.constant 0 : i32
    %c0_i32_0 = arith.constant 0 : i32
    %c0_i32_1 = arith.constant 0 : i32
    return %arg0, %c0_i32, %c0_i32_0 : i32, i32, i32
  }
}

</mosaic_0001>

<bundles_post_ra>
// kernel: ssim_pallas.1
= control target key start
LH: loop header
LB: loop body
LE: loop exit
PB: predicated region body
PF: predicated region fallthrough
CT: control target
= control target key end

     0   :  { %s309_s0 = inlined_call_operand.vmem [shape: f32[9,8,128], index: 0, kind: input, shape index: {}]   ;;  %s310_s1 = inlined_call_operand.vmem [shape: f32[9,8,128], index: 1, kind: input, shape index: {}]   ;;  %s311_s2 = inlined_call_operand.vmem [shape: f32[1,8,128], index: 2, kind: output, shape index: {}]  }
   0x1   :  { %v18_v0 = vld [vmem:[%s309_s0] sm:$0xff]  ;;  %v219_v2 = vld [vmem:[%s309_s0 + $0x8] sm:$0xff]  ;;  %v221_v13 = vld [vmem:[%s309_s0 + $0x10] sm:$0xff] }
   0x2   :  { %v19_v1 = vld [vmem:[%s310_s1] sm:$0xff]  ;;  %v20_v3 = vmul.f32 0.094741665, %v18_v0  ;;  %v22_v5 = vmul.f32 %v18_v0, %v18_v0  ;;  %v220_v8 = vld [vmem:[%s310_s1 + $0x8] sm:$0xff]  ;;  %v33_v9 = vmul.f32 0.118318014, %v219_v2  ;;  %v37_v11 = vmul.f32 %v219_v2, %v219_v2 }
   0x3   :  { %v21_v4 = vmul.f32 0.094741665, %v19_v1  ;;  %v24_v6 = vmul.f32 %v19_v1, %v19_v1  ;;  %v26_v7 = vmul.f32 %v19_v1, %v18_v0  ;;  %v35_v10 = vmul.f32 0.118318014, %v220_v8  ;;  %v222_v14 = vld [vmem:[%s310_s1 + $0x10] sm:$0xff]  ;;  %v223_v26 = vld [vmem:[%s309_s0 + $0x18] sm:$0xff] }
   0x4   :  { %v40_v12 = vmul.f32 %v220_v8, %v220_v8  ;;  %v23_v15 = vmul.f32 0.094741665, %v22_v5  ;;  %v34_v17 = vadd.f32 %v33_v9, %v20_v3  ;;  %v38_v20 = vmul.f32 0.118318014, %v37_v11  ;;  %v224_v31 = vld [vmem:[%s310_s1 + $0x18] sm:$0xff]  ;;  %v225_v36 = vld [vmem:[%s309_s0 + $0x20] sm:$0xff] }
   0x5   :  { %v25_v16 = vmul.f32 0.094741665, %v24_v6  ;;  %v27_v18 = vmul.f32 0.094741665, %v26_v7  ;;  %v36_v19 = vadd.f32 %v35_v10, %v21_v4  ;;  %v43_v22 = vmul.f32 %v220_v8, %v219_v2  ;;  %v226_v45 = vld [vmem:[%s310_s1 + $0x20] sm:$0xff]  ;;  %v227_v54 = vld [vmem:[%s309_s0 + $0x28] sm:$0xff] }
   0x6   :  { %v41_v21 = vmul.f32 0.118318014, %v40_v12  ;;  %v51_v23 = vmul.f32 0.094741665, %v221_v13  ;;  %v53_v24 = vmul.f32 0.094741665, %v222_v14  ;;  %v55_v25 = vmul.f32 %v221_v13, %v221_v13 }
   0x7   :  { %v39_v27 = vadd.f32 %v38_v20, %v23_v15  ;;  %v58_v29 = vmul.f32 %v222_v14, %v222_v14  ;;  %v61_v30 = vmul.f32 %v222_v14, %v221_v13  ;;  %v44_v32 = vmul.f32 0.118318014, %v43_v22  ;;  %v228_v59 = vld [vmem:[%s310_s1 + $0x28] sm:$0xff]  ;;  %v229_v4 = vld [vmem:[%s309_s0 + $0x30] sm:$0xff] }
   0x8   :  { %v42_v28 = vadd.f32 %v41_v21, %v25_v16  ;;  %v52_v33 = vadd.f32 %v51_v23, %v34_v17  ;;  %v54_v34 = vadd.f32 %v53_v24, %v36_v19  ;;  %v56_v35 = vmul.f32 0.094741665, %v55_v25  ;;  %v230_v13 = vld [vmem:[%s310_s1 + $0x30] sm:$0xff] }
   0x9   :  { %v59_v37 = vmul.f32 0.094741665, %v58_v29  ;;  %v62_v38 = vmul.f32 0.094741665, %v61_v30  ;;  %v69_v39 = vmul.f32 0.118318014, %v223_v26  ;;  %v73_v40 = vmul.f32 %v223_v26, %v223_v26 }
   0xa   :  { %v45_v41 = vadd.f32 %v44_v32, %v27_v18  ;;  %v57_v42 = vadd.f32 %v56_v35, %v39_v27  ;;  %v71_v43 = vmul.f32 0.118318014, %v224_v31  ;;  %v76_v44 = vmul.f32 %v224_v31, %v224_v31  ;;  %v231_v18 = vld [vmem:[%s309_s0 + $0x38] sm:$0xff]  ;;  %v233_v35 = vld [vmem:[%s309_s0 + $0x40] sm:$0xff] }
   0xb   :  { %v60_v46 = vadd.f32 %v59_v37, %v42_v28  ;;  %v70_v47 = vadd.f32 %v69_v39, %v52_v33  ;;  %v74_v48 = vmul.f32 0.118318014, %v73_v40  ;;  %v79_v49 = vmul.f32 %v224_v31, %v223_v26  ;;  %v232_v27 = vld [vmem:[%s310_s1 + $0x38] sm:$0xff]  ;;  %v234_v40 = vld [vmem:[%s310_s1 + $0x40] sm:$0xff] }
   0xc   :  { %v63_v50 = vadd.f32 %v62_v38, %v45_v41  ;;  %v72_v51 = vadd.f32 %v71_v43, %v54_v34  ;;  %v77_v52 = vmul.f32 0.118318014, %v76_v44  ;;  %v87_v53 = vmul.f32 0.1477613, %v225_v36 }
   0xd   :  { %v75_v55 = vadd.f32 %v74_v48, %v57_v42  ;;  %v80_v56 = vmul.f32 0.118318014, %v79_v49  ;;  %v89_v57 = vmul.f32 0.1477613, %v226_v45  ;;  %v91_v58 = vmul.f32 %v225_v36, %v225_v36 }
   0xe   :  { %v78_v60 = vadd.f32 %v77_v52, %v60_v46  ;;  %v88_v61 = vadd.f32 %v87_v53, %v70_v47  ;;  %v94_v62 = vmul.f32 %v226_v45, %v226_v45  ;;  %v97_v63 = vmul.f32 %v226_v45, %v225_v36 }
   0xf   :  { %v81_v0 = vadd.f32 %v80_v56, %v63_v50  ;;  %v90_v1 = vadd.f32 %v89_v57, %v72_v51  ;;  %v92_v2 = vmul.f32 0.1477613, %v91_v58  ;;  %v105_v3 = vmul.f32 0.118318014, %v227_v54 }
  0x10   :  { %v95_v5 = vmul.f32 0.1477613, %v94_v62  ;;  %v98_v6 = vmul.f32 0.1477613, %v97_v63  ;;  %v107_v7 = vmul.f32 0.118318014, %v228_v59  ;;  %v109_v8 = vmul.f32 %v227_v54, %v227_v54 }
  0x11   :  { %v93_v9 = vadd.f32 %v92_v2, %v75_v55  ;;  %v106_v10 = vadd.f32 %v105_v3, %v88_v61  ;;  %v112_v11 = vmul.f32 %v228_v59, %v228_v59  ;;  %v115_v12 = vmul.f32 %v228_v59, %v227_v54 }
  0x12   :  { %v96_v14 = vadd.f32 %v95_v5, %v78_v60  ;;  %v99_v15 = vadd.f32 %v98_v6, %v81_v0  ;;  %v108_v16 = vadd.f32 %v107_v7, %v90_v1  ;;  %v110_v17 = vmul.f32 0.118318014, %v109_v8 }
  0x13   :  { %v113_v19 = vmul.f32 0.118318014, %v112_v11  ;;  %v116_v20 = vmul.f32 0.118318014, %v115_v12  ;;  %v123_v21 = vmul.f32 0.094741665, %v229_v4  ;;  %v127_v22 = vmul.f32 %v229_v4, %v229_v4 }
  0x14   :  { %v111_v23 = vadd.f32 %v110_v17, %v93_v9  ;;  %v125_v24 = vmul.f32 0.094741665, %v230_v13  ;;  %v130_v25 = vmul.f32 %v230_v13, %v230_v13  ;;  %v133_v26 = vmul.f32 %v230_v13, %v229_v4 }
  0x15   :  { %v114_v28 = vadd.f32 %v113_v19, %v96_v14  ;;  %v124_v29 = vadd.f32 %v123_v21, %v106_v10  ;;  %v128_v30 = vmul.f32 0.094741665, %v127_v22  ;;  %v117_v31 = vadd.f32 %v116_v20, %v99_v15 }
  0x16   :  { %v126_v32 = vadd.f32 %v125_v24, %v108_v16  ;;  %v131_v33 = vmul.f32 0.094741665, %v130_v25  ;;  %v141_v34 = vmul.f32 0.118318014, %v231_v18  ;;  %v143_v37 = vmul.f32 0.118318014, %v232_v27 }
  0x17   :  { %v129_v36 = vadd.f32 %v128_v30, %v111_v23  ;;  %v145_v38 = vmul.f32 %v231_v18, %v231_v18  ;;  %v148_v39 = vmul.f32 %v232_v27, %v232_v27  ;;  %v134_v42 = vmul.f32 0.094741665, %v133_v26 }
  0x18   :  { %v132_v41 = vadd.f32 %v131_v33, %v114_v28  ;;  %v142_v43 = vadd.f32 %v141_v34, %v124_v29  ;;  %v151_v44 = vmul.f32 %v232_v27, %v231_v18  ;;  %v144_v45 = vadd.f32 %v143_v37, %v126_v32 }
  0x19   :  { %v146_v46 = vmul.f32 0.118318014, %v145_v38  ;;  %v149_v47 = vmul.f32 0.118318014, %v148_v39  ;;  %v159_v48 = vmul.f32 0.094741665, %v233_v35  ;;  %v163_v50 = vmul.f32 %v233_v35, %v233_v35 }
  0x1a   :  { %v161_v49 = vmul.f32 0.094741665, %v234_v40  ;;  %v166_v51 = vmul.f32 %v234_v40, %v234_v40  ;;  %v135_v58 = vadd.f32 %v134_v42, %v117_v31  ;;  %v152_v59 = vmul.f32 0.118318014, %v151_v44 }
  0x1b   :  { %v147_v52 = vadd.f32 %v146_v46, %v129_v36  ;;  %v150_v53 = vadd.f32 %v149_v47, %v132_v41  ;;  %v160_v54 = vadd.f32 %v159_v48, %v142_v43  ;;  %v164_v56 = vmul.f32 0.094741665, %v163_v50 }
  0x1c   :  { %v162_v55 = vadd.f32 %v161_v49, %v144_v45  ;;  %v167_v57 = vmul.f32 0.094741665, %v166_v51  ;;  %v169_v60 = vmul.f32 %v234_v40, %v233_v35  ;;  %v153_v4 = vadd.f32 %v152_v59, %v135_v58 }
  0x1d   :  { %v172_v61 = vmul.f32 %v160_v54, %v160_v54  ;;  %v165_v62 = vadd.f32 %v164_v56, %v147_v52  ;;  %v11_v12 = vlaneseq }
  0x1e   :  { %v168_v63 = vadd.f32 %v167_v57, %v150_v53  ;;  %v173_v0 = vmul.f32 %v162_v55, %v162_v55  ;;  %v170_v5 = vmul.f32 0.094741665, %v169_v60  ;;  %v174_v10 = vmul.f32 %v162_v55, %v160_v54 }
  0x1f   :  { %v175_v1 = vsub.f32 %v165_v62, %v172_v61  ;;  %v12_v14 = vshrl.u32 %v11_v12, 7  ;;  %v14_v17 = vand.u32 127, %v11_v12 }
  0x20   :  { %v176_v2 = vsub.f32 %v168_v63, %v173_v0  ;;  %v183_v3 = vadd.f32 %v173_v0, %v172_v61  ;;  %v171_v9 = vadd.f32 %v170_v5, %v153_v4  ;;  %v178_v15 = vmul.f32 2.0, %v174_v10 }
  0x21   :  { %v15_v18 = vmul.u32 128, %v12_v14 }
  0x22   :  { %v184_v6 = vadd.f32 0.0001, %v183_v3  ;;  %v185_v7 = vadd.f32 %v176_v2, %v175_v1  ;;  %v177_v13 = vsub.f32 %v171_v9, %v174_v10  ;;  %v179_v19 = vadd.f32 0.0001, %v178_v15 }
  0x23   :  { %v16_v23 = vadd.s32 %v15_v18, %v14_v17 }
  0x24   :  { %v186_v8 = vadd.f32 0.0009, %v185_v7  ;;  %v180_v16 = vmul.f32 2.0, %v177_v13 }
  0x25   :  { %vm195_vm0 = vcmp.lt.s32.totalorder %v16_v23, 288 }
  0x26   :  { %v187_v11 = vmul.f32 %v186_v8, %v184_v6  ;;  %v181_v20 = vadd.f32 0.0009, %v180_v16 }
  0x28   :  { %235 = vrcp.f32 %v187_v11  ;;  %v182_v24 = vmul.f32 %v181_v20, %v179_v19 }
  0x32   :  { %v236_v21 = vpop.eup %235 }
  0x33   :  { %v189_v22 = vmul.f32 %v236_v21, %v187_v11 }
  0x35   :  { %v190_v25 = vsub.f32 2.0, %v189_v22 }
  0x37   :  { %v191_v26 = vmul.f32 %v236_v21, %v190_v25 }
  0x39   :  { %v192_v27 = vmul.f32 %v191_v26, %v182_v24 }
  0x3b   :  { %v196_v28 = vsel %vm195_vm0, %v192_v27, 0.0 }
  0x3c   :  { %198 = vst [vmem:[%s311_s2] sm:$0xff] %v196_v28 }

</bundles_post_ra>
